<compile_context>
chip_gen: v6e
topology: v6e:2x2x1
jax: 0.10.0
libtpu: 0.0.40
codegen_flags: <defaults>
</compile_context>

<pallas_src>
import math

import jax
import jax.numpy as jnp
from jax import lax
from jax.experimental import pallas as pl
from jax.experimental.pallas import tpu as pltpu


def _token_embedding_kernel(x_ref, w_ref, o_ref):
    # x_ref : (L, C)     full sequence for this batch element (resident)
    # w_ref : (3, C, D)  tap matrices W0, W1, W2 (resident)
    # o_ref : (TL, D)    current output tile
    TL = o_ref.shape[0]
    L, C = x_ref.shape

    start = pl.multiple_of(pl.program_id(1) * TL, TL)

    # Centre window and its circular neighbour rows (scalar index math only).
    x_mid = x_ref[pl.ds(start, TL), :]                    # (TL, C)
    prev_row = x_ref[pl.ds((start + L - 1) % L, 1), :]    # (1, C) = x[(start-1) % L]
    next_row = x_ref[pl.ds((start + TL) % L, 1), :]       # (1, C) = x[(start+TL) % L]

    # Shift the window one row in each direction (XLU sublane rotation), then
    # patch the single wrapped row with the true circular neighbour.
    row = lax.broadcasted_iota(jnp.int32, (TL, C), 0)
    x_prev = jnp.where(row == 0,
                       jnp.broadcast_to(prev_row, (TL, C)),
                       pltpu.roll(x_mid, shift=1, axis=0))
    x_next = jnp.where(row == TL - 1,
                       jnp.broadcast_to(next_row, (TL, C)),
                       pltpu.roll(x_mid, shift=TL - 1, axis=0))

    # Three small K=C MXU passes, accumulated in f32 (free under the memory
    # roofline; avoids the lane-dim concat entirely).
    acc = jnp.dot(x_prev, w_ref[0], preferred_element_type=jnp.float32)
    acc = acc + jnp.dot(x_mid, w_ref[1], preferred_element_type=jnp.float32)
    acc = acc + jnp.dot(x_next, w_ref[2], preferred_element_type=jnp.float32)
    o_ref[...] = acc.astype(o_ref.dtype)


def _max_block_bytes():
    """Per-generation output-block budget: 8 MiB on 128 MiB-VMEM chips, 4 MiB on v7x."""
    try:
        info = pltpu.get_tpu_info()
        cap = getattr(info, "vmem_capacity_bytes", 64 * 1024 * 1024)
    except Exception:  # pragma: no cover - conservative fallback
        cap = 64 * 1024 * 1024
    return 8 * 1024 * 1024 if cap >= 96 * 1024 * 1024 else 4 * 1024 * 1024


def _pick_seq_tile(L, C, D, itemsize, sub, max_block_bytes):
    """Largest multiple-of-`sub` divisor of L whose per-tile working set fits."""
    if L % sub != 0:
        return L  # full-extent block is always a legal shape
    # Per output row: D output elems + ~4*C for x_mid/x_prev/x_next/slack.
    bytes_per_row = (D + 4 * C) * itemsize
    max_rows = max(sub, max_block_bytes // max(bytes_per_row, 1))
    if L <= max_rows:
        return L
    best, t = sub, sub
    while t <= max_rows:
        if L % t == 0:
            best = t
        t += sub
    return best


def token_embedding(x, weight, *, seq_tile=None):
    """x: (B, L, c_in); weight: (d_model, c_in, 3) [PyTorch Conv1d layout]."""
    B, L, C = x.shape
    D = weight.shape[0]
    assert weight.shape == (D, C, 3)

    # (d_model, c_in, 3) -> (3, c_in, d_model): w[k] is tap-k matrix Wk (C, D).
    w = jnp.transpose(weight, (2, 1, 0)).astype(x.dtype)

    itemsize = jnp.dtype(x.dtype).itemsize
    # Sublane-pack multiple: 8 for f32, 16 for bf16, 32 for int8/fp8.
    sub = max(8, 32 // itemsize)

    if seq_tile is None:
        TL = _pick_seq_tile(L, C, D, itemsize, sub, _max_block_bytes())
    else:
        assert L % seq_tile == 0, "seq_tile must divide L"
        TL = seq_tile
    grid = (B, L // TL)

    # Double-buffered output block + resident input/weights, with headroom.
    vmem_need = (2 * TL * D + 2 * L * C + 2 * 3 * C * D) * itemsize
    vmem_limit = int(min(max(2 * vmem_need + (4 << 20), 16 << 20), 48 << 20))

    cost = pl.CostEstimate(
        flops=2 * B * L * 3 * C * D,
        transcendentals=0,
        bytes_accessed=(B * L * C + B * L * D + 3 * C * D) * itemsize,
    )

    return pl.pallas_call(
        _token_embedding_kernel,
        out_shape=jax.ShapeDtypeStruct((B, L, D), x.dtype),
        grid_spec=pltpu.PrefetchScalarGridSpec(
            num_scalar_prefetch=0,
            grid=grid,
            in_specs=[
                # Full (L, C) per batch element; block index constant in j, so
                # it is fetched once per batch element, not once per L-tile.
                pl.BlockSpec((None, L, C), lambda b, j: (b, 0, 0)),
                # Tap weights, resident for the whole grid.
                pl.BlockSpec((3, C, D), lambda b, j: (0, 0, 0)),
            ],
            out_specs=pl.BlockSpec((None, TL, D), lambda b, j: (b, j, 0)),
        ),
        compiler_params=pltpu.CompilerParams(
            dimension_semantics=("parallel", "parallel"),
            vmem_limit_bytes=vmem_limit,
        ),
        cost_estimate=cost,
    )(x, w)


def _reference(x, weight):
    """Pure-JAX reference: circular-padded conv1d, channels-last, f32."""
    xp = jnp.concatenate([x[:, -1:, :], x, x[:, :1, :]], axis=1)  # (B, L+2, C)
    L = x.shape[1]
    return sum(jnp.einsum("blc,oc->blo", xp[:, k:k + L, :], weight[:, :, k])
               for k in range(3))


if __name__ == "__main__":
    key = jax.random.PRNGKey(0)

    def make_case(case_key, B, L, C, D):
        kx, kw = jax.random.split(case_key)
        x = jax.random.normal(kx, (B, L, C), dtype=jnp.float32)
        # Kaiming-normal (fan_in, leaky_relu), matching nn.init.kaiming_normal_
        # on a Conv1d weight of shape (d_model, c_in, 3).
        fan_in = C * 3
        gain = math.sqrt(2.0 / (1.0 + 0.01 ** 2))
        std = gain / math.sqrt(fan_in)
        w = std * jax.random.normal(kw, (D, C, 3), dtype=jnp.float32)
        return x, w

    cases = [
        # (B, L, C, D, dtype,         seq_tile, tol)
        (2, 16, 4, 32, jnp.float32, 8, 1e-4),      # tiled path (TL < L), D % 128 != 0
        (2, 8, 4, 128, jnp.float32, None, 1e-4),   # lane-dense output, single tile
        (2, 16, 4, 32, jnp.bfloat16, None, 5e-2),  # low-precision path
    ]
    keys = jax.random.split(key, len(cases))
    for case_key, (B, L, C, D, dtype, tl, tol) in zip(keys, cases):
        x_f32, w_f32 = make_case(case_key, B, L, C, D)
        x = x_f32.astype(dtype)
        out = jax.block_until_ready(token_embedding(x, w_f32, seq_tile=tl))
        ref = _reference(x.astype(jnp.float32), w_f32)
        assert out.shape == (B, L, D)
        assert jnp.allclose(out.astype(jnp.float32), ref, atol=tol, rtol=tol), (
            f"mismatch for case B={B} L={L} C={C} D={D} dtype={dtype} tile={tl}")

    print("KERNEL_OK")
</pallas_src>

<mosaic_0001>
module attributes {stable_mosaic.version = 11 : i64} {
  func.func @_token_embedding_kernel(%arg0: i32, %arg1: i32, %arg2: memref<1x16x4xf32, #tpu.memory_space<vmem>>, %arg3: memref<3x4x32xf32, #tpu.memory_space<vmem>>, %arg4: memref<1x8x32xf32, #tpu.memory_space<vmem>>) attributes {dimension_semantics = [#tpu.dimension_semantics<parallel>, #tpu.dimension_semantics<parallel>], iteration_bounds = array<i64: 2, 2>, scalar_prefetch = 0 : i64, scratch_operands = 0 : i64, tpu.core_type = #tpu.core_type<tc>, window_params = [{transform_indices = @transform_0, window_bounds = array<i64: 1, 16, 4>}, {pipeline_mode = #tpu.pipeline_mode<synchronous>, transform_indices = @transform_1, window_bounds = array<i64: 3, 4, 32>}, {transform_indices = @transform_2, window_bounds = array<i64: 1, 8, 32>}]} {
    %c8_i32 = arith.constant 8 : i32
    %0 = arith.muli %arg1, %c8_i32 : i32
    %1 = tpu.assume_multiple %0, 8 : i32
    %c0 = arith.constant 0 : index
    %2 = arith.index_cast %1 : i32 to index
    %c0_0 = arith.constant 0 : index
    %3 = vector.load %arg2[%c0, %2, %c0_0] : memref<1x16x4xf32, #tpu.memory_space<vmem>>, vector<1x8x4xf32>
    %4 = vector.shape_cast %3 : vector<1x8x4xf32> to vector<8x4xf32>
    %c16_i32 = arith.constant 16 : i32
    %5 = arith.addi %1, %c16_i32 : i32
    %c1_i32 = arith.constant 1 : i32
    %6 = arith.subi %5, %c1_i32 : i32
    %c16_i32_1 = arith.constant 16 : i32
    %c0_i32 = arith.constant 0 : i32
    %7 = arith.cmpi eq, %c16_i32_1, %c0_i32 : i32
    %c1_i32_2 = arith.constant 1 : i32
    %8 = arith.select %7, %c1_i32_2, %c16_i32_1 : i32
    %9 = arith.remsi %6, %8 : i32
    %c0_i32_3 = arith.constant 0 : i32
    %10 = arith.cmpi ne, %9, %c0_i32_3 : i32
    %c0_i32_4 = arith.constant 0 : i32
    %11 = arith.cmpi slt, %9, %c0_i32_4 : i32
    %c0_i32_5 = arith.constant 0 : i32
    %12 = arith.cmpi slt, %8, %c0_i32_5 : i32
    %13 = arith.xori %11, %12 : i1
    %14 = arith.andi %13, %10 : i1
    %15 = arith.addi %9, %8 : i32
    %16 = arith.select %14, %15, %9 : i32
    %c0_6 = arith.constant 0 : index
    %17 = arith.index_cast %16 : i32 to index
    %c0_7 = arith.constant 0 : index
    %18 = vector.load %arg2[%c0_6, %17, %c0_7] : memref<1x16x4xf32, #tpu.memory_space<vmem>>, vector<1x1x4xf32>
    %19 = vector.shape_cast %18 : vector<1x1x4xf32> to vector<1x4xf32>
    %c8_i32_8 = arith.constant 8 : i32
    %20 = arith.addi %1, %c8_i32_8 : i32
    %c16_i32_9 = arith.constant 16 : i32
    %c0_i32_10 = arith.constant 0 : i32
    %21 = arith.cmpi eq, %c16_i32_9, %c0_i32_10 : i32
    %c1_i32_11 = arith.constant 1 : i32
    %22 = arith.select %21, %c1_i32_11, %c16_i32_9 : i32
    %23 = arith.remsi %20, %22 : i32
    %c0_i32_12 = arith.constant 0 : i32
    %24 = arith.cmpi ne, %23, %c0_i32_12 : i32
    %c0_i32_13 = arith.constant 0 : i32
    %25 = arith.cmpi slt, %23, %c0_i32_13 : i32
    %c0_i32_14 = arith.constant 0 : i32
    %26 = arith.cmpi slt, %22, %c0_i32_14 : i32
    %27 = arith.xori %25, %26 : i1
    %28 = arith.andi %27, %24 : i1
    %29 = arith.addi %23, %22 : i32
    %30 = arith.select %28, %29, %23 : i32
    %c0_15 = arith.constant 0 : index
    %31 = arith.index_cast %30 : i32 to index
    %c0_16 = arith.constant 0 : index
    %32 = vector.load %arg2[%c0_15, %31, %c0_16] : memref<1x16x4xf32, #tpu.memory_space<vmem>>, vector<1x1x4xf32>
    %33 = vector.shape_cast %32 : vector<1x1x4xf32> to vector<1x4xf32>
    %34 = tpu.iota {dimensions = array<i32: 0>} : vector<8x4xi32>
    %c0_i32_17 = arith.constant 0 : i32
    %35 = vector.broadcast %c0_i32_17 : i32 to vector<8x4xi32>
    %36 = arith.cmpi eq, %34, %35 : vector<8x4xi32>
    %37 = vector.shape_cast %19 : vector<1x4xf32> to vector<1x4xf32>
    %38 = vector.broadcast %37 : vector<1x4xf32> to vector<8x4xf32>
    %c1_i32_18 = arith.constant 1 : i32
    %39 = tpu.dynamic_rotate %4 by %c1_i32_18 dim 0 : vector<8x4xf32>, i32 -> vector<8x4xf32>
    %40 = arith.select %36, %38, %39 : vector<8x4xi1>, vector<8x4xf32>
    %c7_i32 = arith.constant 7 : i32
    %41 = vector.broadcast %c7_i32 : i32 to vector<8x4xi32>
    %42 = arith.cmpi eq, %34, %41 : vector<8x4xi32>
    %43 = vector.shape_cast %33 : vector<1x4xf32> to vector<1x4xf32>
    %44 = vector.broadcast %43 : vector<1x4xf32> to vector<8x4xf32>
    %c7_i32_19 = arith.constant 7 : i32
    %45 = tpu.dynamic_rotate %4 by %c7_i32_19 dim 0 : vector<8x4xf32>, i32 -> vector<8x4xf32>
    %46 = arith.select %42, %44, %45 : vector<8x4xi1>, vector<8x4xf32>
    %c0_20 = arith.constant 0 : index
    %c0_21 = arith.constant 0 : index
    %c0_22 = arith.constant 0 : index
    %47 = vector.load %arg3[%c0_20, %c0_21, %c0_22] : memref<3x4x32xf32, #tpu.memory_space<vmem>>, vector<1x4x32xf32>
    %48 = vector.shape_cast %47 : vector<1x4x32xf32> to vector<4x32xf32>
    %cst = arith.constant dense<0.000000e+00> : vector<8x32xf32>
    %49 = tpu.matmul %40, %48, %cst {dimension_numbers = #tpu.dot_dimension_numbers<[1], [0], [0], [1], [0, 0, 1, 1], [], []>} : vector<8x4xf32>, vector<4x32xf32>, vector<8x32xf32> -> vector<8x32xf32>
    %c1 = arith.constant 1 : index
    %c0_23 = arith.constant 0 : index
    %c0_24 = arith.constant 0 : index
    %50 = vector.load %arg3[%c1, %c0_23, %c0_24] : memref<3x4x32xf32, #tpu.memory_space<vmem>>, vector<1x4x32xf32>
    %51 = vector.shape_cast %50 : vector<1x4x32xf32> to vector<4x32xf32>
    %cst_25 = arith.constant dense<0.000000e+00> : vector<8x32xf32>
    %52 = tpu.matmul %4, %51, %cst_25 {dimension_numbers = #tpu.dot_dimension_numbers<[1], [0], [0], [1], [0, 0, 1, 1], [], []>} : vector<8x4xf32>, vector<4x32xf32>, vector<8x32xf32> -> vector<8x32xf32>
    %53 = arith.addf %49, %52 : vector<8x32xf32>
    %c2 = arith.constant 2 : index
    %c0_26 = arith.constant 0 : index
    %c0_27 = arith.constant 0 : index
    %54 = vector.load %arg3[%c2, %c0_26, %c0_27] : memref<3x4x32xf32, #tpu.memory_space<vmem>>, vector<1x4x32xf32>
    %55 = vector.shape_cast %54 : vector<1x4x32xf32> to vector<4x32xf32>
    %cst_28 = arith.constant dense<0.000000e+00> : vector<8x32xf32>
    %56 = tpu.matmul %46, %55, %cst_28 {dimension_numbers = #tpu.dot_dimension_numbers<[1], [0], [0], [1], [0, 0, 1, 1], [], []>} : vector<8x4xf32>, vector<4x32xf32>, vector<8x32xf32> -> vector<8x32xf32>
    %57 = arith.addf %53, %56 : vector<8x32xf32>
    %c0_29 = arith.constant 0 : index
    %c0_30 = arith.constant 0 : index
    %c0_31 = arith.constant 0 : index
    %58 = vector.load %arg4[%c0_29, %c0_30, %c0_31] : memref<1x8x32xf32, #tpu.memory_space<vmem>>, vector<1x8x32xf32>
    %59 = vector.shape_cast %58 : vector<1x8x32xf32> to vector<8x32xf32>
    %60 = vector.shape_cast %57 : vector<8x32xf32> to vector<1x8x32xf32>
    tpu.vector_store %arg4[%c0_29, %c0_30, %c0_31], %60 {strides = array<i32>} : memref<1x8x32xf32, #tpu.memory_space<vmem>>, vector<1x8x32xf32>,
    return
  }
  func.func @transform_0(%arg0: i32, %arg1: i32) -> (i32, i32, i32) {
    %c0_i32 = arith.constant 0 : i32
    %c0_i32_0 = arith.constant 0 : i32
    %c0_i32_1 = arith.constant 0 : i32
    return %arg0, %c0_i32, %c0_i32_0 : i32, i32, i32
  }
  func.func @transform_1(%arg0: i32, %arg1: i32) -> (i32, i32, i32) {
    %c0_i32 = arith.constant 0 : i32
    %c0_i32_0 = arith.constant 0 : i32
    %c0_i32_1 = arith.constant 0 : i32
    %c0_i32_2 = arith.constant 0 : i32
    return %c0_i32, %c0_i32_0, %c0_i32_1 : i32, i32, i32
  }
  func.func @transform_2(%arg0: i32, %arg1: i32) -> (i32, i32, i32) {
    %c0_i32 = arith.constant 0 : i32
    %c0_i32_0 = arith.constant 0 : i32
    return %arg0, %arg1, %c0_i32 : i32, i32, i32
  }
}

</mosaic_0001>

<bundles_post_ra>
// kernel: tpu_custom_call.1
= control target key start
LH: loop header
LB: loop body
LE: loop exit
PB: predicated region body
PF: predicated region fallthrough
CT: control target
= control target key end

     0   :  { %7 = vsyncpa [#allocation3], 0  ;;  %s918_s0 = inlined_call_operand.vmem [shape: f32[2,16,4], index: 0, kind: input, shape index: {}]   ;;  %s919_s1 = inlined_call_operand.vmem [shape: f32[3,4,32], index: 1, kind: input, shape index: {}]   ;;  %s920_s2 = inlined_call_operand.hbm [shape: f32[2,16,32], index: 2, kind: output, shape index: {}]  }
   0x1   :  { %9 = vsyncpa [#allocation3 + $0x1], 0  ;;  %s772_s9 = smov 0   ;;  %s774_s10 = smov 0  }
   0x2   :  { %s776_s11 = smov 0   ;;  %s778_s12 = smov 0  }
   0x3   :  { %s780_s13 = smov 0   ;;  %s782_s14 = smov 0  }
   0x4   :  { %s784_s15 = smov 0   ;;  %s786_s16 = smov 0  }
   0x5 LB: > { %s535_s17 = sadd.s32 4294967295, %s752_s16   ;;  %s536_s18 = sadd.s32 4294967294, %s752_s16   ;;  %s752_s16 = sphi %s786_s16, %s15_s16   ;;  %s748_s15 = sphi %s784_s15, %s929_s15   ;;  %s744_s14 = sphi %s782_s14, %s928_s14   ;;  %s740_s13 = sphi %s780_s13, %s927_s13   ;;  %s736_s12 = sphi %s778_s12, %s926_s12   ;;  %s732_s11 = sphi %s776_s11, %s925_s11   ;;  %s728_s10 = sphi %s774_s10, %s924_s10   ;;  %s724_s9 = sphi %s772_s9, %s923_s9  }
   0x6   : > { %s24_s19 = sadd.s32 1, %s744_s14  ;;  %s27_s20 = sadd.s32 1, %s748_s15 }
   0x7   : > { %p25_p0 = scmp.ge.s32.totalorder %s24_s19, 2  ;;  %p93_p1 = scmp.ne.s32.totalorder %s732_s11, %s728_s10 }
   0x8   : > { %p94_p2 = scmp.eq.s32.totalorder %s535_s17, 3  ;;  %p99_p5 = scmp.ne.s32.totalorder %s728_s10, %s724_s9 }
   0x9   : > { %s931_s19 = smov (%p25_p0, %s24_s19), 0  ;;  %s933_s20 = smov (!%p25_p0, %s27_s20), %s748_s15 }
   0xa   : > { %s79_s21 = ssub.s32 %s744_s14, %s931_s19  ;;  %p823_p3 = por %p94_p2, %p93_p1 }
   0xb   : > { %p29_p4 = scmp.ge.s32.totalorder %s933_s20, 2  ;;  %p100_p6 = scmp.eq.s32.totalorder %s536_s18, 3 }
   0xc   : > { %p539_p7 = scmp.ge.s32.totalorder %s752_s16, 1  ;;  %p129_p9 = scmp.lt.s32.totalorder %s752_s16, 5 }
   0xd   : > { %s935_s20 = smov (%p29_p4, %s933_s20), 0  ;;  %p832_p8 = por %p100_p6, %p99_p5 }
   0xe   : > { %s78_s24 = ssub.s32 %s748_s15, %s935_s20  ;;  %s83_s25 = sadd.s32 1, %s732_s11 }
   0xf   : > { %s80_s26 = sor.u32 %s79_s21, %s78_s24  ;;  %p130_p10 = pnand %p539_p7, %p129_p9 }
  0x10   : > { %p81_p11 = scmp.eq.s32.totalorder %s80_s26, 0  ;;  %p151_p12 = scmp.lt.s32.totalorder (!%p130_p10), %s740_s13, 1 }
  0x11   : > { %133 = sbr.rel (%p130_p10) target bundleno = 245 (0xf5), region = 28  ;;  %s543_s30 = sshll.u32 (!%p130_p10), %s736_s12, 3 }
  0x12   : > { %s841_s27 = scalar_select %p81_p11, %s732_s11, %s83_s25  }
  0x13   : > { %s159_s6 = sadd.s32 (!%p130_p10), 15, %s543_s30  ;;  %s174_s8 = sadd.s32 (!%p130_p10), 8, %s543_s30 }
  0x14   : > { %s161_s24 = ssub.s32 (!%p130_p10), 0, %s159_s6  ;;  %p175_p13 = scmp.lt.s32.totalorder (!%p130_p10), %s174_s8, 0 }
  0x15   : > { %s544_s26 = smin.u32 (!%p130_p10), %s161_s24, %s159_s6  ;;  %s176_s4 = ssub.s32 (!%p130_p10), 0, %s174_s8 }
  0x16   : > { %v552_v0 = vld [vmem:[%s919_s1 + $0x4] sm:$0xf]  ;;  %vm212_vm0 = vcmask 1043456   ;;  %v754_v1 = vmov 0.0   ;;  %vm755_vm1 = vmmov 0   ;;  %s152_s5 = scalar_select %p151_p12, %s740_s13, 1  ;;  %v189_v5 = vlaneseq }
  0x17   : > { %572 = vmatprep.subr.mxu0 %v754_v1  ;;  %574 = vmatprep.mubr.msk.f32.mxu0 %vm755_vm1, %v754_v1  ;;  %v205_v2 = vld [vmem:[%s919_s1] sm:$0xf]  ;;  %vm208_vm2 = vcmask 31744   ;;  %v557_v3 = vld [vmem:[%s919_s1 + $0x8] sm:$0xf]  ;;  %s163_s3 = sand.u32 15, %s544_s26  }
  0x18   : > { %573 = vmatpush3.msk.msra.mxu0 %vm212_vm0, %v552_v0  ;;  %577 = vmatprep.subr.mxu1 %v754_v1  ;;  %s565_s7 = sshll.u32 %s152_s5, 4  ;;  %p160_p0 = scmp.lt.s32.totalorder %s159_s6, 0  ;;  %v190_v6 = vshrl.u32 %v189_v5, 7  ;;  %vm441_vm5 = vcmask 261120  }
  0x19   : > { %582 = vmatprep.subr.mxu0 %v754_v1  ;;  %578 = vmatpush3.msk.msra.mxu1 %vm212_vm0, %v205_v2  ;;  %s859_s21 = scalar_lea.vmem %s918_s0, %s565_s7  ;;  %s547_s5 = smin.u32 %s176_s4, %s174_s8 }
  0x1a   : > { %579 = vmatprep.mubr.msk.f32.mxu1 %vm755_vm1, %v754_v1  ;;  %s157_s25 = scalar_lea.vmem %s859_s21, %s543_s30  ;;  %s164_s7 = ssub.s32 0, %s163_s3  ;;  %vm198_vm3 = vcmp.eq.s32.totalorder %v190_v6, 7  ;;  %vm191_vm4 = vcmp.eq.s32.totalorder %v190_v6, 0 }
  0x1b   : > { %v158_v4 = vld [vmem:[%s157_s25] sm:$0xff]  ;;  %s178_s30 = sand.u32 15, %s547_s5   ;;  %s939_s7 = smov (!%p160_p0, %s164_s7), %s163_s3 }
  0x1c   : > { %575 = vmatmul.mubr.msk.f32.vlgmr.msra.gmra.mxu0 %vm208_vm2, %v158_v4  ;;  %s179_s17 = ssub.s32 0, %s178_s30  ;;  %p546_p2 = scmp.lt.s32.totalorder %s939_s7, 0  ;;  %v203_v7 = vrot.slane %v158_v4, 1  ;;  %v196_v8 = vrot.slane %v158_v4, 7 }
  0x1d   : > { %583 = vmatpush3.msk.msra.mxu0 %vm212_vm0, %v557_v3  ;;  %584 = vmatprep.mubr.msk.f32.mxu0 %vm755_vm1, %v754_v1  ;;  %s937_s17 = smov (!%p175_p13, %s179_s17), %s178_s30  ;;  %s170_s24 = sadd.s32 16, %s939_s7 }
  0x1e   : > { %p549_p1 = scmp.lt.s32.totalorder %s937_s17, 0  ;;  %s185_s18 = sadd.s32 16, %s937_s17 }
  0x1f   : > { %s943_s24 = smov (!%p546_p2, %s170_s24), %s939_s7  ;;  %s148_s25 = sand.u32 1, %s728_s10  }
  0x20   : > { %s941_s18 = smov (!%p549_p1, %s185_s18), %s937_s17  ;;  %s172_s8 = scalar_lea.vmem %s859_s21, %s943_s24 }
  0x21   : > { %s187_s6 = scalar_lea.vmem %s859_s21, %s941_s18  ;;  %v550_v10 = vld [vmem:[%s172_s8] ss:$0 sm:$0xff]  ;;  %s540_s26 = sshll.u32 %s148_s25, 3 }
  0x22   : > { %v551_v9 = vld [vmem:[%s187_s6] ss:$0 sm:$0xff]  ;;  %v197_v12 = vsel %vm191_vm4, %v550_v10, %v196_v8  ;;  %s561_s28 = sshll.u32 %s740_s13, 1  ;;  %s150_s4 = scalar_lea.vmem [#allocation2], %s540_s26 }
  0x23   : > { %v204_v11 = vsel %vm198_vm3, %v551_v9, %v203_v7  ;;  %580 = vmatmul.mubr.msk.f32.vlgmr.msra.gmra.mxu1 %vm208_vm2, %v197_v12  ;;  %s455_s29 = sadd.s32 %s736_s12, %s561_s28  ;;  %s459_s21 = sshll.u32 %s150_s4, 4  ;;  %s460_s21 = int_to_ptr.vmem [resolvable:$true] %s459_s21 }
  0x24   : > { %585 = vmatmul.mubr.msk.f32.vlgmr.msra.gmra.mxu0 %vm208_vm2, %v204_v11  ;;  %s562_s3 = sshll.u32 %s455_s29, 7  ;;  %s444_s17 = scalar_lea.sflag [#allocation3], %s148_s25 }
  0x25   : > { %s457_s30 = scalar_lea.hbm %s920_s2, %s562_s3  ;;  %s660_s13 = scalar_lea.vmem %s460_s21, 128 }
  0x26   : > { %p661_p4 = scmp.ne.s32.totalorder %s460_s21, %s660_s13  ;;  %s756_s12 = smov [#allocation2]  }
  0x27   : > { %s664_s18 = sshll.u32 %s756_s12, 4  ;;  %s665_s18 = int_to_ptr.vmem [resolvable:$false] %s664_s18 }
  0x28   : > { %p662_p5 = pnand %p661_p4, %p823_p3  ;;  %s666_s24 = scalar_lea.vmem %s665_s18, 256 }
  0x29   : > { %p667_p7 = scmp.lt.s32.totalorder %s460_s21, %s665_s18  ;;  %p668_p9 = scmp.lt.s32.totalorder %s666_s24, %s660_s13 }
  0x2a   : > { %p663_p6 = pneg %p662_p5 }
  0x2b   : > { %p669_p10 = por %p668_p9, %p667_p7 }
  0x2d   : > { %p670_p11 = pnand %p669_p10, %p663_p6 }
  0xdc   : > { %v282_v13 = vpop.f32.mrf.mxu0 }
  0xde   : > { %v576_v14 = vpop.f32.mrf.mxu0 }
  0xe3   : > { %v358_v16 = vpop.f32.mrf.mxu1 }
  0xe4   : > { %v436_v15 = vpop.f32.mrf.mxu0  ;;  %v359_v17 = vadd.f32 %v358_v16, %v282_v13 }
  0xe5   : > { %v581_v19 = vpop.f32.mrf.mxu1 }
  0xe6   : > { %v586_v18 = vpop.f32.mrf.mxu0  ;;  %v440_v20 = vadd.f32 %v436_v15, %v359_v17 }
  0xe8   : > { %442 = vst.msk [vmem:[%s150_s4] sm:$0xff] %vm441_vm5, %v440_v20 }
  0xe9   : > { %673 = shalt.err (!%p670_p11)
}
  0xea   : > { %s674_s6 = scalar_lea.hbm %s457_s30, 128  ;;  %s678_s26 = scalar_lea.hbm %s920_s2, 512 }
  0xeb   : > { %p675_p12 = scmp.ne.s32.totalorder %s457_s30, %s674_s6  ;;  %p679_p1 = scmp.lt.s32.totalorder %s457_s30, %s920_s2 }
  0xec   : > { %p680_p2 = scmp.lt.s32.totalorder %s678_s26, %s674_s6 }
  0xed   : > { %p676_p13 = pnand %p675_p12, %p823_p3 }
  0xee   : > { %p681_p4 = por %p680_p2, %p679_p1 }
  0xef   : > { %p677_p0 = pneg %p676_p13 }
  0xf1   : > { %p682_p5 = pnand %p681_p4, %p677_p0 }
  0xf3   : > { %685 = shalt.err (!%p682_p5)
}
  0xf4   : > { %587 = dma.vmem_to_hbm [thread:$0]  (%p823_p3), %s460_s21, 128, %s457_s30, %s444_s17  }
  0xf5 PF: > { %p593_p6 = scmp.ge.s32.totalorder %s752_s16, 2  ;;  %s471_s3 = sand.u32 1, %s724_s9  }
  0xf6   : > { %s472_s4 = scalar_lea.sflag [#allocation3], %s471_s3 }
  0xf7   : > { %p590_p7 = pnand %p593_p6, %p832_p8 }
  0xf9   : > { %p591_p9 = pneg %p590_p7 }
  0xfb   : > { %719 = dma.done.wait (%p591_p9), %s472_s4, 128  }
  0xfc   : > { %721 = vsyncadd (%p591_p9), %s472_s4, 4294967168  ;;  %s15_s16 = sadd.s32 1, %s752_s16   ;;  %s923_s9 = smov %s728_s10 }
  0xfd   : > { %p12_p10 = scmp.ge.s32.totalorder %s15_s16, 6   ;;  %s924_s10 = smov %s732_s11 }
  0xfe   : > { %s925_s11 = smov %s841_s27  ;;  %s926_s12 = smov %s744_s14 }
  0xff   : > { %s927_s13 = smov %s748_s15  ;;  %s928_s14 = smov %s931_s19 }
 0x100   : > { %s929_s15 = smov %s935_s20  ;;  %14 = sbr.rel (!%p12_p10) target bundleno = 5 (0x5), region = 68 }
 0x105   :  { %477 = vsyncpa [#allocation3], 1 }
 0x106   :  { %479 = vsyncpa [#allocation3 + $0x1], 1 }

</bundles_post_ra>
